<compile_context>
chip_gen: v5e
topology: v5e:2x2
jax: 0.10.0
libtpu: 0.0.40
codegen_flags: <defaults>
</compile_context>

<pallas_src>
import functools
from typing import NamedTuple

import jax
import jax.numpy as jnp
from jax.experimental import pallas as pl
from jax.experimental.pallas import tpu as pltpu


# --------------------------------------------------------------------------- #
# Small helpers
# --------------------------------------------------------------------------- #
def _round_up(x, m):
    return (x + m - 1) // m * m


def _cdiv(a, b):
    return (a + b - 1) // b


def _pad2(a, rows, cols):
    r, c = a.shape
    if r == rows and c == cols:
        return a
    return jnp.pad(a, ((0, rows - r), (0, cols - c)))


def _pick_divisor_tile(dim, cap):
    """Largest tile <= cap (multiple of 128) that divides dim (dim % 128 == 0)."""
    t = min(dim, cap)
    while dim % t:
        t -= 128
    return t


def _default_vmem_limit():
    """Generation-aware VMEM budget: capacity - ~20 MiB headroom, capped at 100 MiB.

    v5e/v6e (128 MiB) -> 100 MiB; v7x (64 MiB/TC) -> 44 MiB; unknown -> 44 MiB.
    """
    try:
        cap = int(pltpu.get_tpu_info().vmem_capacity_bytes)
    except Exception:
        cap = 64 << 20  # conservative (v7x per-TensorCore)
    return max(32 << 20, min(cap - (20 << 20), 100 << 20))


@functools.lru_cache(maxsize=None)
def _single_buffer_supported():
    """One-time, compile-only capability check for pl.Buffered(1) on inputs.

    Replaces the old try/except around the *real* kernel (which swallowed
    genuine errors and could execute the kernel twice).
    """
    try:
        def _k(x_ref, o_ref):
            o_ref[...] = x_ref[...] * 2.0

        fn = pl.pallas_call(
            _k,
            out_shape=jax.ShapeDtypeStruct((16, 128), jnp.float32),
            grid=(2,),
            in_specs=[pl.BlockSpec((8, 128), lambda i: (0, 0),
                                   pipeline_mode=pl.Buffered(1))],
            out_specs=pl.BlockSpec((8, 128), lambda i: (i, 0)),
        )
        jax.jit(fn).lower(jax.ShapeDtypeStruct((8, 128), jnp.float32)).compile()
        return True
    except Exception:
        return False


# --------------------------------------------------------------------------- #
# Kernels
# --------------------------------------------------------------------------- #
def _mlp_kernel(n_layers, x_ref, *refs):
    """Fused forward pass for the whole (padded) MLP on one batch tile.

    refs = (w0, b0, w1, b1, ..., w_{L-1}, b_{L-1}, out_ref)
    MXU matmuls take native-dtype operands with f32 accumulation; bias-add and
    ReLU run on the VPU; inter-layer activations are kept in the param dtype.
    """
    out_ref = refs[-1]
    wb = refs[:-1]
    h = x_ref[...]
    for i in range(n_layers):
        w = wb[2 * i][...]
        b = wb[2 * i + 1][...]
        acc = jnp.dot(h, w, preferred_element_type=jnp.float32)
        acc = acc + b.astype(jnp.float32)
        if i < n_layers - 1:
            acc = jnp.maximum(acc, 0.0)
            h = acc.astype(w.dtype)  # keep inter-layer activation in native dtype
        else:
            h = acc
    out_ref[...] = h.astype(out_ref.dtype)


def _linear_kernel(apply_relu, x_ref, w_ref, b_ref, o_ref, acc_ref):
    """One Linear (+ optional ReLU) with K-reduction over the last grid axis."""
    k = pl.program_id(2)

    @pl.when(k == 0)
    def _():
        acc_ref[...] = jnp.zeros_like(acc_ref)

    acc_ref[...] += jnp.dot(x_ref[...], w_ref[...],
                            preferred_element_type=jnp.float32)

    @pl.when(k == pl.num_programs(2) - 1)
    def _():
        r = acc_ref[...] + b_ref[...].astype(jnp.float32)
        if apply_relu:
            r = jnp.maximum(r, 0.0)
        o_ref[...] = r.astype(o_ref.dtype)


# --------------------------------------------------------------------------- #
# Forward implementations (jitted; all config is static)
# --------------------------------------------------------------------------- #
class _Cfg(NamedTuple):
    batch_tile: int
    pdims: tuple          # padded feature dims, len = n_layers + 1
    single_buffer: bool
    vmem_limit_bytes: int
    output_dim: int


@functools.partial(jax.jit, static_argnums=(0,))
def _fused_forward(cfg, x, *flat_params):
    batch = x.shape[0]
    bt = cfg.batch_tile
    batch_p = _round_up(batch, bt)
    n_layers = len(cfg.pdims) - 1
    dtype = flat_params[0].dtype

    x_p = jnp.pad(x.astype(dtype),
                  ((0, batch_p - batch), (0, cfg.pdims[0] - x.shape[1])))

    in_specs = [pl.BlockSpec((bt, cfg.pdims[0]), lambda i: (i, 0))]
    for li in range(n_layers):
        w_shape = (cfg.pdims[li], cfg.pdims[li + 1])
        b_shape = (1, cfg.pdims[li + 1])
        if cfg.single_buffer:
            # Grid-invariant blocks: resident in VMEM, no double-buffering.
            in_specs.append(pl.BlockSpec(w_shape, lambda i: (0, 0),
                                         pipeline_mode=pl.Buffered(1)))
            in_specs.append(pl.BlockSpec(b_shape, lambda i: (0, 0),
                                         pipeline_mode=pl.Buffered(1)))
        else:
            in_specs.append(pl.BlockSpec(w_shape, lambda i: (0, 0)))
            in_specs.append(pl.BlockSpec(b_shape, lambda i: (0, 0)))

    flops = 2 * batch_p * sum(cfg.pdims[i] * cfg.pdims[i + 1]
                              for i in range(n_layers))
    bytes_accessed = (int(x_p.size) * x_p.dtype.itemsize
                      + sum(int(a.size) * a.dtype.itemsize for a in flat_params)
                      + batch_p * cfg.pdims[-1] * jnp.dtype(dtype).itemsize)

    out_p = pl.pallas_call(
        functools.partial(_mlp_kernel, n_layers),
        out_shape=jax.ShapeDtypeStruct((batch_p, cfg.pdims[-1]), dtype),
        grid_spec=pltpu.PrefetchScalarGridSpec(
            num_scalar_prefetch=0,
            grid=(batch_p // bt,),
            in_specs=in_specs,
            out_specs=pl.BlockSpec((bt, cfg.pdims[-1]), lambda i: (i, 0)),
        ),
        compiler_params=pltpu.CompilerParams(
            dimension_semantics=("parallel",),
            vmem_limit_bytes=cfg.vmem_limit_bytes),
        cost_estimate=pl.CostEstimate(flops=flops, transcendentals=0,
                                      bytes_accessed=bytes_accessed),
    )(x_p, *flat_params)
    return out_p[:batch, :cfg.output_dim]


def _linear_pallas(x_p, w_p, b_p, apply_relu, tm, tn, tk, vmem_limit_bytes):
    M, K = x_p.shape
    N = w_p.shape[1]
    flops = 2 * M * K * N
    bytes_accessed = (int(x_p.size) * x_p.dtype.itemsize
                      + int(w_p.size) * w_p.dtype.itemsize
                      + int(b_p.size) * b_p.dtype.itemsize
                      + M * N * x_p.dtype.itemsize)
    return pl.pallas_call(
        functools.partial(_linear_kernel, apply_relu),
        out_shape=jax.ShapeDtypeStruct((M, N), x_p.dtype),
        grid_spec=pltpu.PrefetchScalarGridSpec(
            num_scalar_prefetch=0,
            grid=(M // tm, N // tn, K // tk),
            in_specs=[pl.BlockSpec((tm, tk), lambda i, j, k: (i, k)),
                      pl.BlockSpec((tk, tn), lambda i, j, k: (k, j)),
                      pl.BlockSpec((1, tn), lambda i, j, k: (0, j))],
            out_specs=pl.BlockSpec((tm, tn), lambda i, j, k: (i, j)),
            scratch_shapes=[pltpu.VMEM((tm, tn), jnp.float32)]),
        compiler_params=pltpu.CompilerParams(
            dimension_semantics=("parallel", "parallel", "arbitrary"),
            vmem_limit_bytes=vmem_limit_bytes),
        cost_estimate=pl.CostEstimate(flops=flops, transcendentals=0,
                                      bytes_accessed=bytes_accessed),
    )(x_p, w_p, b_p)


@functools.partial(jax.jit, static_argnums=(0,))
def _layered_forward(cfg, x, *flat_params):
    """Fallback path: per-layer K/N-tiled Linear(+ReLU) kernels (weights don't
    need to be fully resident in VMEM)."""
    batch = x.shape[0]
    bt = cfg.batch_tile
    batch_p = _round_up(batch, bt)
    n_layers = len(cfg.pdims) - 1
    dtype = flat_params[0].dtype

    h = jnp.pad(x.astype(dtype),
                ((0, batch_p - batch), (0, cfg.pdims[0] - x.shape[1])))
    for li in range(n_layers):
        w_p = flat_params[2 * li]
        b_p = flat_params[2 * li + 1]
        K, N = w_p.shape
        tk = _pick_divisor_tile(K, 512)
        tn = _pick_divisor_tile(N, 512)
        h = _linear_pallas(h, w_p, b_p, li < n_layers - 1, bt, tn, tk,
                           cfg.vmem_limit_bytes)
    return h[:batch, :cfg.output_dim]


# --------------------------------------------------------------------------- #
# User-facing wrapper (pads params once, picks tiles / VMEM budget, dispatches)
# --------------------------------------------------------------------------- #
class PallasMLP:
    def __init__(self, params, *, lane_multiple=128, vmem_limit_bytes=None,
                 batch_tile=None, mode="auto"):
        """params: list of (W, b) with W: [in, out], b: [1, out] (or [out])."""
        assert mode in ("auto", "fused", "layered")
        self.mode = mode
        self.n_layers = len(params)
        self.input_dim = params[0][0].shape[0]
        self.output_dim = params[-1][0].shape[1]
        self.dtype = jnp.asarray(params[0][0]).dtype

        dims = [self.input_dim] + [w.shape[1] for (w, _) in params]
        self.pdims = tuple(_round_up(d, lane_multiple) for d in dims)

        # Pad parameters ONCE (hoisted out of the per-call hot path).
        flat = []
        for li, (w, b) in enumerate(params):
            flat.append(_pad2(jnp.asarray(w), self.pdims[li], self.pdims[li + 1]))
            flat.append(_pad2(jnp.asarray(b).reshape(1, -1), 1, self.pdims[li + 1]))
        self.flat_params = tuple(jax.device_put(a) for a in flat)
        self.resident_weight_bytes = sum(int(a.size) * a.dtype.itemsize
                                         for a in self.flat_params)

        if vmem_limit_bytes is None:
            vmem_limit_bytes = _default_vmem_limit()
        self.vmem_limit_bytes = int(vmem_limit_bytes)
        self._fixed_batch_tile = batch_tile
        self._single_buffer = _single_buffer_supported()
        # TODO(synk): optionally quantize resident weights (fp8 on v7x / int8 on
        # v6e) to halve VMEM residency and weight DMA when accuracy permits.

    # ---- static (Python) decisions on shapes / budgets ---------------------
    def _pick_batch_tile(self, batch):
        if self._fixed_batch_tile is not None:
            return self._fixed_batch_tile
        # dtype sublane pack minimum: f32 -> 8, bf16 -> 16, int8/fp8 -> 32
        pack = max(8, 32 // jnp.dtype(self.dtype).itemsize)
        # generation-aware cap: 512 rows on 128-MiB parts, 256 on v7x (64 MiB)
        cap = 512 if self.vmem_limit_bytes >= (80 << 20) else 256
        if batch <= cap:
            if batch >= 256:
                # two tiles >= 128 rows each: megacore parts shard the batch axis
                return _round_up(_cdiv(batch, 2), pack)
            # small batch: one sublane-aligned tile (no tiny multi-step grids)
            return max(_round_up(batch, pack), pack)
        return cap

    def _fused_vmem_bytes(self, batch_tile):
        item = jnp.dtype(self.dtype).itemsize
        w = self.resident_weight_bytes * (1 if self._single_buffer else 2)
        io = 2 * batch_tile * (self.pdims[0] + self.pdims[-1]) * item
        act = 3 * batch_tile * max(self.pdims) * 4   # f32 acc + live activations
        return w + io + act

    # ---- forward ------------------------------------------------------------
    def __call__(self, x):
        batch = x.shape[0]
        bt = self._pick_batch_tile(batch)
        # Shrink the batch tile (never below 128) before giving up on fusion.
        while bt > 128 and self._fused_vmem_bytes(bt) > self.vmem_limit_bytes:
            bt = max(128, bt // 2)
        fits = self._fused_vmem_bytes(bt) <= self.vmem_limit_bytes
        use_fused = (self.mode == "fused") or (self.mode == "auto" and fits)
        cfg = _Cfg(batch_tile=bt, pdims=self.pdims,
                   single_buffer=self._single_buffer,
                   vmem_limit_bytes=self.vmem_limit_bytes,
                   output_dim=self.output_dim)
        if use_fused:
            return _fused_forward(cfg, x, *self.flat_params)
        # TODO(synk): a single fused call with in-kernel K/N tiling via
        # pltpu.emit_pipeline would avoid re-reading activations per layer.
        return _layered_forward(cfg, x, *self.flat_params)


def mlp_forward(x, params, **kwargs):
    """Convenience one-shot wrapper (prefer constructing PallasMLP once)."""
    return PallasMLP(params, **kwargs)(x)


# --------------------------------------------------------------------------- #
# Init / reference
# --------------------------------------------------------------------------- #
def init_mlp_params(key, input_dim, width, depth, output_dim, dtype=jnp.float32):
    """Deterministic init mimicking nn.Linear's U(-1/sqrt(fan_in), 1/sqrt(fan_in))."""
    dims = [input_dim] + [width] * depth + [output_dim]
    params = []
    for i in range(len(dims) - 1):
        fan_in, fan_out = dims[i], dims[i + 1]
        key, kw, kb = jax.random.split(key, 3)
        bound = 1.0 / (fan_in ** 0.5)
        w = jax.random.uniform(kw, (fan_in, fan_out), jnp.float32, -bound, bound)
        b = jax.random.uniform(kb, (1, fan_out), jnp.float32, -bound, bound)
        params.append((w.astype(dtype), b.astype(dtype)))
    return params


def mlp_reference(x, params):
    h = x
    for i, (w, b) in enumerate(params):
        h = h @ w + b
        if i < len(params) - 1:
            h = jnp.maximum(h, 0.0)
    return h


# --------------------------------------------------------------------------- #
# Demo / correctness check
# --------------------------------------------------------------------------- #
if __name__ == "__main__":
    # Module hyperparameters: MLP(input_dim, width, depth, output_dim)
    input_dim, width, depth, output_dim = 16, 32, 3, 8
    batch = 16

    key = jax.random.PRNGKey(0)
    key, kx, kb = jax.random.split(key, 3)
    x = jax.random.normal(kx, (batch, input_dim), dtype=jnp.float32)

    params_f32 = init_mlp_params(key, input_dim, width, depth, output_dim, jnp.float32)
    ref = mlp_reference(x, params_f32)

    # Fused path, f32 params.
    mlp_f32 = PallasMLP(params_f32)
    out = jax.block_until_ready(mlp_f32(x))
    assert out.shape == (batch, output_dim)
    assert jnp.allclose(out, ref, atol=1e-5, rtol=1e-5), "f32 mismatch vs reference"

    # bf16 params: native MXU operands on all generations, f32 accumulation.
    params_bf16 = [(w.astype(jnp.bfloat16), b.astype(jnp.bfloat16))
                   for (w, b) in params_f32]
    mlp_bf16 = PallasMLP(params_bf16)
    out_bf16 = jax.block_until_ready(mlp_bf16(x))
    ref_bf16 = mlp_reference(
        x, [(w.astype(jnp.float32), b.astype(jnp.float32)) for (w, b) in params_bf16])
    assert out_bf16.shape == (batch, output_dim)
    assert jnp.allclose(out_bf16.astype(jnp.float32), ref_bf16,
                        atol=5e-2, rtol=5e-2), "bf16 mismatch vs reference"

    # Multi-tile batch: 2 grid steps, "parallel" axis shards across TCs on megacore.
    x_big = jax.random.normal(kb, (384, input_dim), dtype=jnp.float32)
    out_big = jax.block_until_ready(mlp_f32(x_big))
    ref_big = mlp_reference(x_big, params_f32)
    assert jnp.allclose(out_big, ref_big, atol=1e-4, rtol=1e-4), "batched mismatch"

    # Exercise the per-layer tiled fallback path (used when resident weights
    # would exceed the VMEM budget).
    mlp_layered = PallasMLP(params_f32, mode="layered")
    out_l = jax.block_until_ready(mlp_layered(x))
    assert jnp.allclose(out_l, ref, atol=1e-5, rtol=1e-5), "layered-path mismatch"

    print("KERNEL_OK")
</pallas_src>

<mosaic_0001>
module attributes {stable_mosaic.version = 11 : i64} {
  func.func @_mlp_kernel(%arg0: i32, %arg1: memref<16x128xf32, #tpu.memory_space<vmem>>, %arg2: memref<128x128xf32, #tpu.memory_space<vmem>>, %arg3: memref<1x128xf32, #tpu.memory_space<vmem>>, %arg4: memref<128x128xf32, #tpu.memory_space<vmem>>, %arg5: memref<1x128xf32, #tpu.memory_space<vmem>>, %arg6: memref<128x128xf32, #tpu.memory_space<vmem>>, %arg7: memref<1x128xf32, #tpu.memory_space<vmem>>, %arg8: memref<128x128xf32, #tpu.memory_space<vmem>>, %arg9: memref<1x128xf32, #tpu.memory_space<vmem>>, %arg10: memref<16x128xf32, #tpu.memory_space<vmem>>) attributes {dimension_semantics = [#tpu.dimension_semantics<parallel>], iteration_bounds = array<i64: 1>, scalar_prefetch = 0 : i64, scratch_operands = 0 : i64, tpu.core_type = #tpu.core_type<tc>, window_params = [{transform_indices = @transform_0, window_bounds = array<i64: 16, 128>}, {pipeline_mode = #tpu.pipeline_mode<synchronous>, transform_indices = @transform_1, window_bounds = array<i64: 128, 128>}, {pipeline_mode = #tpu.pipeline_mode<synchronous>, transform_indices = @transform_2, window_bounds = array<i64: 1, 128>}, {pipeline_mode = #tpu.pipeline_mode<synchronous>, transform_indices = @transform_3, window_bounds = array<i64: 128, 128>}, {pipeline_mode = #tpu.pipeline_mode<synchronous>, transform_indices = @transform_4, window_bounds = array<i64: 1, 128>}, {pipeline_mode = #tpu.pipeline_mode<synchronous>, transform_indices = @transform_5, window_bounds = array<i64: 128, 128>}, {pipeline_mode = #tpu.pipeline_mode<synchronous>, transform_indices = @transform_6, window_bounds = array<i64: 1, 128>}, {pipeline_mode = #tpu.pipeline_mode<synchronous>, transform_indices = @transform_7, window_bounds = array<i64: 128, 128>}, {pipeline_mode = #tpu.pipeline_mode<synchronous>, transform_indices = @transform_8, window_bounds = array<i64: 1, 128>}, {transform_indices = @transform_9, window_bounds = array<i64: 16, 128>}]} {
    %c0 = arith.constant 0 : index
    %c0_0 = arith.constant 0 : index
    %0 = vector.load %arg1[%c0, %c0_0] : memref<16x128xf32, #tpu.memory_space<vmem>>, vector<16x128xf32>
    %c0_1 = arith.constant 0 : index
    %c0_2 = arith.constant 0 : index
    %1 = vector.load %arg2[%c0_1, %c0_2] : memref<128x128xf32, #tpu.memory_space<vmem>>, vector<128x128xf32>
    %c0_3 = arith.constant 0 : index
    %c0_4 = arith.constant 0 : index
    %2 = vector.load %arg3[%c0_3, %c0_4] : memref<1x128xf32, #tpu.memory_space<vmem>>, vector<1x128xf32>
    %cst = arith.constant dense<0.000000e+00> : vector<16x128xf32>
    %3 = tpu.matmul %0, %1, %cst {dimension_numbers = #tpu.dot_dimension_numbers<[1], [0], [0], [1], [0, 0, 1, 1], [], []>} : vector<16x128xf32>, vector<128x128xf32>, vector<16x128xf32> -> vector<16x128xf32>
    %4 = vector.broadcast %2 : vector<1x128xf32> to vector<16x128xf32>
    %5 = arith.addf %3, %4 : vector<16x128xf32>
    %cst_5 = arith.constant 0.000000e+00 : f32
    %6 = vector.broadcast %cst_5 : f32 to vector<16x128xf32>
    %7 = arith.maximumf %5, %6 : vector<16x128xf32>
    %c0_6 = arith.constant 0 : index
    %c0_7 = arith.constant 0 : index
    %8 = vector.load %arg4[%c0_6, %c0_7] : memref<128x128xf32, #tpu.memory_space<vmem>>, vector<128x128xf32>
    %c0_8 = arith.constant 0 : index
    %c0_9 = arith.constant 0 : index
    %9 = vector.load %arg5[%c0_8, %c0_9] : memref<1x128xf32, #tpu.memory_space<vmem>>, vector<1x128xf32>
    %cst_10 = arith.constant dense<0.000000e+00> : vector<16x128xf32>
    %10 = tpu.matmul %7, %8, %cst_10 {dimension_numbers = #tpu.dot_dimension_numbers<[1], [0], [0], [1], [0, 0, 1, 1], [], []>} : vector<16x128xf32>, vector<128x128xf32>, vector<16x128xf32> -> vector<16x128xf32>
    %11 = vector.broadcast %9 : vector<1x128xf32> to vector<16x128xf32>
    %12 = arith.addf %10, %11 : vector<16x128xf32>
    %cst_11 = arith.constant 0.000000e+00 : f32
    %13 = vector.broadcast %cst_11 : f32 to vector<16x128xf32>
    %14 = arith.maximumf %12, %13 : vector<16x128xf32>
    %c0_12 = arith.constant 0 : index
    %c0_13 = arith.constant 0 : index
    %15 = vector.load %arg6[%c0_12, %c0_13] : memref<128x128xf32, #tpu.memory_space<vmem>>, vector<128x128xf32>
    %c0_14 = arith.constant 0 : index
    %c0_15 = arith.constant 0 : index
    %16 = vector.load %arg7[%c0_14, %c0_15] : memref<1x128xf32, #tpu.memory_space<vmem>>, vector<1x128xf32>
    %cst_16 = arith.constant dense<0.000000e+00> : vector<16x128xf32>
    %17 = tpu.matmul %14, %15, %cst_16 {dimension_numbers = #tpu.dot_dimension_numbers<[1], [0], [0], [1], [0, 0, 1, 1], [], []>} : vector<16x128xf32>, vector<128x128xf32>, vector<16x128xf32> -> vector<16x128xf32>
    %18 = vector.broadcast %16 : vector<1x128xf32> to vector<16x128xf32>
    %19 = arith.addf %17, %18 : vector<16x128xf32>
    %cst_17 = arith.constant 0.000000e+00 : f32
    %20 = vector.broadcast %cst_17 : f32 to vector<16x128xf32>
    %21 = arith.maximumf %19, %20 : vector<16x128xf32>
    %c0_18 = arith.constant 0 : index
    %c0_19 = arith.constant 0 : index
    %22 = vector.load %arg8[%c0_18, %c0_19] : memref<128x128xf32, #tpu.memory_space<vmem>>, vector<128x128xf32>
    %c0_20 = arith.constant 0 : index
    %c0_21 = arith.constant 0 : index
    %23 = vector.load %arg9[%c0_20, %c0_21] : memref<1x128xf32, #tpu.memory_space<vmem>>, vector<1x128xf32>
    %cst_22 = arith.constant dense<0.000000e+00> : vector<16x128xf32>
    %24 = tpu.matmul %21, %22, %cst_22 {dimension_numbers = #tpu.dot_dimension_numbers<[1], [0], [0], [1], [0, 0, 1, 1], [], []>} : vector<16x128xf32>, vector<128x128xf32>, vector<16x128xf32> -> vector<16x128xf32>
    %25 = vector.broadcast %23 : vector<1x128xf32> to vector<16x128xf32>
    %26 = arith.addf %24, %25 : vector<16x128xf32>
    %c0_23 = arith.constant 0 : index
    %c0_24 = arith.constant 0 : index
    %27 = vector.load %arg10[%c0_23, %c0_24] : memref<16x128xf32, #tpu.memory_space<vmem>>, vector<16x128xf32>
    tpu.vector_store %arg10[%c0_23, %c0_24], %26 {strides = array<i32>} : memref<16x128xf32, #tpu.memory_space<vmem>>, vector<16x128xf32>,
    return
  }
  func.func @transform_0(%arg0: i32) -> (i32, i32) {
    %c0_i32 = arith.constant 0 : i32
    %c0_i32_0 = arith.constant 0 : i32
    return %arg0, %c0_i32 : i32, i32
  }
  func.func @transform_1(%arg0: i32) -> (i32, i32) {
    %c0_i32 = arith.constant 0 : i32
    %c0_i32_0 = arith.constant 0 : i32
    %c0_i32_1 = arith.constant 0 : i32
    return %c0_i32, %c0_i32_0 : i32, i32
  }
  func.func @transform_2(%arg0: i32) -> (i32, i32) {
    %c0_i32 = arith.constant 0 : i32
    %c0_i32_0 = arith.constant 0 : i32
    %c0_i32_1 = arith.constant 0 : i32
    return %c0_i32, %c0_i32_0 : i32, i32
  }
  func.func @transform_3(%arg0: i32) -> (i32, i32) {
    %c0_i32 = arith.constant 0 : i32
    %c0_i32_0 = arith.constant 0 : i32
    %c0_i32_1 = arith.constant 0 : i32
    return %c0_i32, %c0_i32_0 : i32, i32
  }
  func.func @transform_4(%arg0: i32) -> (i32, i32) {
    %c0_i32 = arith.constant 0 : i32
    %c0_i32_0 = arith.constant 0 : i32
    %c0_i32_1 = arith.constant 0 : i32
    return %c0_i32, %c0_i32_0 : i32, i32
  }
  func.func @transform_5(%arg0: i32) -> (i32, i32) {
    %c0_i32 = arith.constant 0 : i32
    %c0_i32_0 = arith.constant 0 : i32
    %c0_i32_1 = arith.constant 0 : i32
    return %c0_i32, %c0_i32_0 : i32, i32
  }
  func.func @transform_6(%arg0: i32) -> (i32, i32) {
    %c0_i32 = arith.constant 0 : i32
    %c0_i32_0 = arith.constant 0 : i32
    %c0_i32_1 = arith.constant 0 : i32
    return %c0_i32, %c0_i32_0 : i32, i32
  }
  func.func @transform_7(%arg0: i32) -> (i32, i32) {
    %c0_i32 = arith.constant 0 : i32
    %c0_i32_0 = arith.constant 0 : i32
    %c0_i32_1 = arith.constant 0 : i32
    return %c0_i32, %c0_i32_0 : i32, i32
  }
  func.func @transform_8(%arg0: i32) -> (i32, i32) {
    %c0_i32 = arith.constant 0 : i32
    %c0_i32_0 = arith.constant 0 : i32
    %c0_i32_1 = arith.constant 0 : i32
    return %c0_i32, %c0_i32_0 : i32, i32
  }
  func.func @transform_9(%arg0: i32) -> (i32, i32) {
    %c0_i32 = arith.constant 0 : i32
    %c0_i32_0 = arith.constant 0 : i32
    return %arg0, %c0_i32 : i32, i32
  }
}

</mosaic_0001>

<bundles_post_ra>
// kernel: _fused_forward.1
= control target key start
LH: loop header
LB: loop body
LE: loop exit
PB: predicated region body
PF: predicated region fallthrough
CT: control target
= control target key end

     0   :  { %14 = vsyncpa [#allocation3], 0  ;;  %s488_s0 = inlined_call_operand.vmem [shape: f32[16,128], index: 0, kind: input, shape index: {}]   ;;  %s489_s1 = inlined_call_operand.hbm [shape: f32[128,128], index: 1, kind: input, shape index: {}]   ;;  %s490_s2 = inlined_call_operand.vmem [shape: f32[1,128], index: 2, kind: input, shape index: {}]   ;;  %s491_s3 = inlined_call_operand.hbm [shape: f32[128,128], index: 3, kind: input, shape index: {}]   ;;  %s492_s4 = inlined_call_operand.vmem [shape: f32[1,128], index: 4, kind: input, shape index: {}]   ;;  %s493_s5 = inlined_call_operand.hbm [shape: f32[128,128], index: 5, kind: input, shape index: {}]   ;;  %s494_s6 = inlined_call_operand.vmem [shape: f32[1,128], index: 6, kind: input, shape index: {}]   ;;  %s495_s7 = inlined_call_operand.hbm [shape: f32[128,128], index: 7, kind: input, shape index: {}]   ;;  %s496_s8 = inlined_call_operand.vmem [shape: f32[1,128], index: 8, kind: input, shape index: {}]   ;;  %s497_s9 = inlined_call_operand.vmem [shape: f32[16,128], index: 9, kind: output, shape index: {}]  }
   0x1   :  { %15 = vsyncpa [#allocation5], 0 }
   0x2   :  { %16 = vsyncpa [#allocation8], 0  ;;  %s38_s11 = sshll.u32 %s491_s3, 4  ;;  %s396_s12 = smov [#allocation4]   ;;  %s39_s11 = int_to_ptr.hbm [resolvable:$true] %s38_s11 }
   0x3   :  { %s40_s13 = sshll.u32 %s396_s12, 4  ;;  %s23_s16 = sshll.u32 %s489_s1, 4  ;;  %s41_s13 = int_to_ptr.vmem [resolvable:$true] %s40_s13  ;;  %s24_s16 = int_to_ptr.hbm [resolvable:$true] %s23_s16 }
   0x4   :  { %s397_s17 = smov 128   ;;  %s398_s18 = smov 8  }
   0x5   :  { %46 = dma.hbm_to_vmem [thread:$0]  %s39_s11, 2048, %s41_s13, [#allocation5], %s397_s17, %s397_s17, %s398_s18  }
   0x6   :  { %s399_s19 = smov [#allocation2]   ;;  %s53_s23 = sshll.u32 %s493_s5, 4  ;;  %s54_s23 = int_to_ptr.hbm [resolvable:$true] %s53_s23 }
   0x7   :  { %s25_s20 = sshll.u32 %s399_s19, 4  ;;  %s68_s25 = sshll.u32 %s495_s7, 4  ;;  %s26_s20 = int_to_ptr.vmem [resolvable:$true] %s25_s20  ;;  %s69_s25 = int_to_ptr.hbm [resolvable:$true] %s68_s25 }
   0x8   :  { %31 = dma.hbm_to_vmem [thread:$0]  %s24_s16, 2048, %s26_s20, [#allocation3], %s397_s17, %s397_s17, %s398_s18  }
   0x9   :  { %s400_s26 = smov [#allocation6]   ;;  %s401_s1 = smov [#allocation7]  }
   0xa   :  { %s55_s27 = sshll.u32 %s400_s26, 4  ;;  %s70_s28 = sshll.u32 %s401_s1, 4  ;;  %s56_s27 = int_to_ptr.vmem [resolvable:$true] %s55_s27  ;;  %s71_s28 = int_to_ptr.vmem [resolvable:$true] %s70_s28 }
   0xb   :  { %61 = dma.hbm_to_vmem [thread:$0]  %s54_s23, 2048, %s56_s27, [#allocation5], %s397_s17, %s397_s17, %s398_s18  }
   0xc   :  { %76 = dma.hbm_to_vmem [thread:$0]  %s69_s25, 2048, %s71_s28, [#allocation8], %s397_s17, %s397_s17, %s398_s18  }
   0xd   :  { %390 = dma.done.wait [#allocation3], 2048  }
   0xe   :  { %391 = vsyncadd [#allocation3], 4294965248 }
   0xf   :  { %392 = dma.done.wait [#allocation5], 4096  }
  0x10   :  { %393 = vsyncadd [#allocation5], 4294963200 }
  0x11   :  { %394 = dma.done.wait [#allocation8], 2048  }
  0x12   :  { %395 = vsyncadd [#allocation8], 4294965248  ;;  %v112_v0 = vld [vmem:[#allocation2 + $0x78] sm:$0xff]  ;;  %v111_v1 = vld [vmem:[#allocation2 + $0x70] sm:$0xff] }
  0x13   :  { %117 = vmatpush.msra.mxu0 %v112_v0  ;;  %v110_v2 = vld [vmem:[#allocation2 + $0x68] sm:$0xff]  ;;  %v109_v3 = vld [vmem:[#allocation2 + $0x60] sm:$0xff]  ;;  %v108_v4 = vld [vmem:[#allocation2 + $0x58] sm:$0xff] }
  0x14   :  { %v107_v5 = vld [vmem:[#allocation2 + $0x50] sm:$0xff]  ;;  %v157_v6 = vld [vmem:[#allocation4 + $0x78] sm:$0xff]  ;;  %v106_v8 = vld [vmem:[#allocation2 + $0x48] sm:$0xff] }
  0x15   :  { %118 = vmatpush.msra.mxu0 %v111_v1  ;;  %v156_v7 = vld [vmem:[#allocation4 + $0x70] sm:$0xff]  ;;  %162 = vmatpush.msra.mxu1 %v157_v6  ;;  %v155_v9 = vld [vmem:[#allocation4 + $0x68] sm:$0xff]  ;;  %v105_v10 = vld [vmem:[#allocation2 + $0x40] sm:$0xff] }
  0x16   :  { %v154_v11 = vld [vmem:[#allocation4 + $0x60] sm:$0xff]  ;;  %v104_v12 = vld [vmem:[#allocation2 + $0x38] sm:$0xff]  ;;  %v103_v14 = vld [vmem:[#allocation2 + $0x30] sm:$0xff] }
  0x17   :  { %119 = vmatpush.msra.mxu0 %v110_v2  ;;  %163 = vmatpush.msra.mxu1 %v156_v7  ;;  %v153_v13 = vld [vmem:[#allocation4 + $0x58] sm:$0xff]  ;;  %v152_v15 = vld [vmem:[#allocation4 + $0x50] sm:$0xff]  ;;  %v102_v16 = vld [vmem:[#allocation2 + $0x28] sm:$0xff] }
  0x18   :  { %v151_v17 = vld [vmem:[#allocation4 + $0x48] sm:$0xff]  ;;  %v101_v18 = vld [vmem:[#allocation2 + $0x20] sm:$0xff]  ;;  %v100_v20 = vld [vmem:[#allocation2 + $0x18] sm:$0xff] }
  0x19   :  { %120 = vmatpush.msra.mxu0 %v109_v3  ;;  %164 = vmatpush.msra.mxu1 %v155_v9  ;;  %v150_v19 = vld [vmem:[#allocation4 + $0x40] sm:$0xff]  ;;  %v149_v21 = vld [vmem:[#allocation4 + $0x38] sm:$0xff]  ;;  %v99_v22 = vld [vmem:[#allocation2 + $0x10] sm:$0xff] }
  0x1a   :  { %v148_v23 = vld [vmem:[#allocation4 + $0x30] sm:$0xff]  ;;  %v98_v24 = vld [vmem:[#allocation2 + $0x8] sm:$0xff]  ;;  %v97_v26 = vld [vmem:[#allocation2] sm:$0xff] }
  0x1b   :  { %121 = vmatpush.msra.mxu0 %v108_v4  ;;  %165 = vmatpush.msra.mxu1 %v154_v11  ;;  %v147_v25 = vld [vmem:[#allocation4 + $0x28] sm:$0xff]  ;;  %v146_v27 = vld [vmem:[#allocation4 + $0x20] sm:$0xff]  ;;  %v145_v29 = vld [vmem:[#allocation4 + $0x18] sm:$0xff] }
  0x1c   :  { %v95_v28 = vld [vmem:[%s488_s0] sm:$0xff]  ;;  %v96_v30 = vld [vmem:[%s488_s0 + $0x8] sm:$0xff]  ;;  %v144_v31 = vld [vmem:[#allocation4 + $0x10] sm:$0xff] }
  0x1d   :  { %122 = vmatpush.msra.mxu0 %v107_v5  ;;  %166 = vmatpush.msra.mxu1 %v153_v13  ;;  %v143_v32 = vld [vmem:[#allocation4 + $0x8] sm:$0xff]  ;;  %v142_v33 = vld [vmem:[#allocation4] sm:$0xff]  ;;  %v202_v34 = vld [vmem:[#allocation6 + $0x78] sm:$0xff] }
  0x1e   :  { %v201_v35 = vld [vmem:[#allocation6 + $0x70] sm:$0xff]  ;;  %207 = vmatpush.msra.mxu2 %v202_v34  ;;  %v200_v36 = vld [vmem:[#allocation6 + $0x68] sm:$0xff]  ;;  %v199_v37 = vld [vmem:[#allocation6 + $0x60] sm:$0xff] }
  0x1f   :  { %123 = vmatpush.msra.mxu0 %v106_v8  ;;  %167 = vmatpush.msra.mxu1 %v152_v15  ;;  %v198_v38 = vld [vmem:[#allocation6 + $0x58] sm:$0xff]  ;;  %v197_v39 = vld [vmem:[#allocation6 + $0x50] sm:$0xff]  ;;  %v196_v40 = vld [vmem:[#allocation6 + $0x48] sm:$0xff] }
  0x20   :  { %208 = vmatpush.msra.mxu2 %v201_v35  ;;  %v195_v41 = vld [vmem:[#allocation6 + $0x40] sm:$0xff]  ;;  %v194_v42 = vld [vmem:[#allocation6 + $0x38] sm:$0xff]  ;;  %v193_v44 = vld [vmem:[#allocation6 + $0x30] sm:$0xff] }
  0x21   :  { %124 = vmatpush.msra.mxu0 %v105_v10  ;;  %168 = vmatpush.msra.mxu1 %v151_v17  ;;  %v290_v43 = vld [vmem:[%s490_s2] ss:$0 sm:$0xff]  ;;  %v192_v45 = vld [vmem:[#allocation6 + $0x28] sm:$0xff]  ;;  %v190_v50 = vld [vmem:[#allocation6 + $0x18] sm:$0xff] }
  0x22   :  { %209 = vmatpush.msra.mxu2 %v200_v36  ;;  %v191_v48 = vld [vmem:[#allocation6 + $0x20] sm:$0xff]  ;;  %v189_v54 = vld [vmem:[#allocation6 + $0x10] sm:$0xff]  ;;  %v188_v55 = vld [vmem:[#allocation6 + $0x8] sm:$0xff] }
  0x23   :  { %125 = vmatpush.msra.mxu0 %v104_v12  ;;  %169 = vmatpush.msra.mxu1 %v150_v19  ;;  %v187_v56 = vld [vmem:[#allocation6] sm:$0xff]  ;;  %v247_v57 = vld [vmem:[#allocation7 + $0x78] sm:$0xff]  ;;  %v246_v58 = vld [vmem:[#allocation7 + $0x70] sm:$0xff] }
  0x24   :  { %210 = vmatpush.msra.mxu2 %v199_v37  ;;  %252 = vmatpush.msra.mxu3 %v247_v57  ;;  %v245_v59 = vld [vmem:[#allocation7 + $0x68] sm:$0xff]  ;;  %v244_v60 = vld [vmem:[#allocation7 + $0x60] sm:$0xff]  ;;  %v243_v61 = vld [vmem:[#allocation7 + $0x58] sm:$0xff] }
  0x25   :  { %126 = vmatpush.msra.mxu0 %v103_v14  ;;  %170 = vmatpush.msra.mxu1 %v149_v21  ;;  %v242_v62 = vld [vmem:[#allocation7 + $0x50] sm:$0xff]  ;;  %v241_v63 = vld [vmem:[#allocation7 + $0x48] sm:$0xff]  ;;  %v240_v0 = vld [vmem:[#allocation7 + $0x40] sm:$0xff] }
  0x26   :  { %211 = vmatpush.msra.mxu2 %v198_v38  ;;  %253 = vmatpush.msra.mxu3 %v246_v58  ;;  %v239_v1 = vld [vmem:[#allocation7 + $0x38] sm:$0xff]  ;;  %v291_v2 = vld [vmem:[%s492_s4] ss:$0 sm:$0xff]  ;;  %v238_v3 = vld [vmem:[#allocation7 + $0x30] sm:$0xff] }
  0x27   :  { %127 = vmatpush.msra.mxu0 %v102_v16  ;;  %171 = vmatpush.msra.mxu1 %v148_v23  ;;  %v237_v4 = vld [vmem:[#allocation7 + $0x28] sm:$0xff]  ;;  %v236_v7 = vld [vmem:[#allocation7 + $0x20] sm:$0xff]  ;;  %v235_v9 = vld [vmem:[#allocation7 + $0x18] sm:$0xff] }
  0x28   :  { %212 = vmatpush.msra.mxu2 %v197_v39  ;;  %254 = vmatpush.msra.mxu3 %v245_v59  ;;  %v234_v13 = vld [vmem:[#allocation7 + $0x10] sm:$0xff]  ;;  %v233_v14 = vld [vmem:[#allocation7 + $0x8] sm:$0xff]  ;;  %v232_v15 = vld [vmem:[#allocation7] sm:$0xff] }
  0x29   :  { %128 = vmatpush.msra.mxu0 %v101_v18  ;;  %172 = vmatpush.msra.mxu1 %v147_v25  ;;  %v292_v16 = vld [vmem:[%s494_s6] ss:$0 sm:$0xff] }
  0x2a   :  { %213 = vmatpush.msra.mxu2 %v196_v40  ;;  %255 = vmatpush.msra.mxu3 %v244_v60  ;;  %v293_v23 = vld [vmem:[%s496_s8] ss:$0 sm:$0xff] }
  0x2b   :  { %129 = vmatpush.msra.mxu0 %v100_v20  ;;  %173 = vmatpush.msra.mxu1 %v146_v27 }
  0x2c   :  { %214 = vmatpush.msra.mxu2 %v195_v41  ;;  %256 = vmatpush.msra.mxu3 %v243_v61 }
  0x2d   :  { %130 = vmatpush.msra.mxu0 %v99_v22  ;;  %174 = vmatpush.msra.mxu1 %v145_v29 }
  0x2e   :  { %215 = vmatpush.msra.mxu2 %v194_v42  ;;  %257 = vmatpush.msra.mxu3 %v242_v62 }
  0x2f   :  { %131 = vmatpush.msra.mxu0 %v98_v24  ;;  %175 = vmatpush.msra.mxu1 %v144_v31 }
  0x30   :  { %216 = vmatpush.msra.mxu2 %v193_v44  ;;  %258 = vmatpush.msra.mxu3 %v241_v63 }
  0x31   :  { %132 = vmatpush.msra.mxu0 %v97_v26  ;;  %176 = vmatpush.msra.mxu1 %v143_v32 }
  0x32   :  { %133 = vmatmul.f32.vlgmr.msra.gmra.mxu0 %v95_v28  ;;  %217 = vmatpush.msra.mxu2 %v192_v45 }
  0x33   :  { %177 = vmatpush.msra.mxu1 %v142_v33  ;;  %259 = vmatpush.msra.mxu3 %v240_v0 }
  0x34   :  { %218 = vmatpush.msra.mxu2 %v191_v48 }
  0x35   :  { %260 = vmatpush.msra.mxu3 %v239_v1 }
  0x36   :  { %219 = vmatpush.msra.mxu2 %v190_v50 }
  0x37   :  { %261 = vmatpush.msra.mxu3 %v238_v3 }
  0x38   :  { %220 = vmatpush.msra.mxu2 %v189_v54 }
  0x39   :  { %262 = vmatpush.msra.mxu3 %v237_v4 }
  0x3a   :  { %136 = vmatmul.f32.gmra.mxu0 %v96_v30  ;;  %221 = vmatpush.msra.mxu2 %v188_v55 }
  0x3b   :  { %263 = vmatpush.msra.mxu3 %v236_v7 }
  0x3c   :  { %222 = vmatpush.msra.mxu2 %v187_v56 }
  0x3d   :  { %264 = vmatpush.msra.mxu3 %v235_v9 }
  0x3f   :  { %265 = vmatpush.msra.mxu3 %v234_v13 }
  0x41   :  { %266 = vmatpush.msra.mxu3 %v233_v14 }
  0x43   :  { %267 = vmatpush.msra.mxu3 %v232_v15 }
  0xaf   :  { %v134_v46 = vpop.f32.mrf.mxu0 }
  0xb0   :  { %v135_v47 = vadd.f32 %v290_v43, %v134_v46 }
  0xb2   :  { %v140_v49 = vmax.f32 %v135_v47, 0.0 }
  0xb4   :  { %178 = vmatmul.f32.vlgmr.msra.gmra.mxu1 %v140_v49 }
  0xb7   :  { %v137_v51 = vpop.f32.mrf.mxu0 }
  0xb8   :  { %v138_v52 = vadd.f32 %v290_v43, %v137_v51 }
  0xba   :  { %v141_v53 = vmax.f32 %v138_v52, 0.0 }
  0xbc   :  { %181 = vmatmul.f32.gmra.mxu1 %v141_v53 }
 0x131   :  { %v179_v5 = vpop.f32.mrf.mxu1 }
 0x132   :  { %v180_v6 = vadd.f32 %v291_v2, %v179_v5 }
 0x134   :  { %v185_v8 = vmax.f32 %v180_v6, 0.0 }
 0x136   :  { %223 = vmatmul.f32.vlgmr.msra.gmra.mxu2 %v185_v8 }
 0x139   :  { %v182_v10 = vpop.f32.mrf.mxu1 }
 0x13a   :  { %v183_v11 = vadd.f32 %v291_v2, %v182_v10 }
 0x13c   :  { %v186_v12 = vmax.f32 %v183_v11, 0.0 }
 0x13e   :  { %226 = vmatmul.f32.gmra.mxu2 %v186_v12 }
 0x1b9   :  { %v224_v17 = vpop.f32.mrf.mxu2 }
 0x1ba   :  { %v225_v18 = vadd.f32 %v292_v16, %v224_v17 }
 0x1bc   :  { %v230_v19 = vmax.f32 %v225_v18, 0.0 }
 0x1be   :  { %268 = vmatmul.f32.vlgmr.msra.gmra.mxu3 %v230_v19 }
 0x1c1   :  { %v227_v20 = vpop.f32.mrf.mxu2 }
 0x1c2   :  { %v228_v21 = vadd.f32 %v292_v16, %v227_v20 }
 0x1c4   :  { %v231_v22 = vmax.f32 %v228_v21, 0.0 }
 0x1c6   :  { %271 = vmatmul.f32.gmra.mxu3 %v231_v22 }
 0x241   :  { %v269_v24 = vpop.f32.mrf.mxu3 }
 0x242   :  { %v270_v25 = vadd.f32 %v293_v23, %v269_v24 }
 0x244   :  { %275 = vst [vmem:[%s497_s9] sm:$0xff] %v270_v25 }
 0x249   :  { %v272_v26 = vpop.f32.mrf.mxu3 }
 0x24a   :  { %v273_v27 = vadd.f32 %v293_v23, %v272_v26 }
 0x24c   :  { %276 = vst [vmem:[%s497_s9 + $0x8] sm:$0xff] %v273_v27 }
 0x24d   :  { %281 = vsyncpa [#allocation3], 1 }
 0x24e   :  { %282 = vsyncpa [#allocation5], 1 }
 0x24f   :  { %283 = vsyncpa [#allocation8], 1 }

</bundles_post_ra>
